<compile_context>
chip_gen: v5e
topology: v5e:2x2
jax: 0.10.0
libtpu: 0.0.40
codegen_flags: <defaults>
</compile_context>

<pallas_src>
import jax
import jax.numpy as jnp
from jax.experimental import pallas as pl
from jax.experimental.pallas import tpu as pltpu


# ---------- device-side verification kernel (scalar / SMEM only) ----------
def _concat_smem_kernel(a_ref, b_ref, o_ref):
    # a_ref: (2,) int32 in SMEM, b_ref: (2,) int32 in SMEM, o_ref: (4,) int32 in SMEM.
    # Four static scalar copies on the scalar ALU — no vector path at all.
    o_ref[0] = a_ref[0]
    o_ref[1] = a_ref[1]
    o_ref[2] = b_ref[0]
    o_ref[3] = b_ref[1]


# Grid-less pallas_call, built ONCE (hoisted out of any per-call code).
_concat_call = pl.pallas_call(
    _concat_smem_kernel,
    out_shape=jax.ShapeDtypeStruct((4,), jnp.int32),
    in_specs=[
        pl.BlockSpec(memory_space=pltpu.SMEM),
        pl.BlockSpec(memory_space=pltpu.SMEM),
    ],
    out_specs=pl.BlockSpec(memory_space=pltpu.SMEM),
)
_concat_call_jit = jax.jit(_concat_call)


def tuple_add_pallas(x253_tuple, extra_tuple=(12, 64)):
    """Device-side equivalent of operator.add(x253, (12, 64)) — verification only."""
    a = jnp.asarray(x253_tuple, dtype=jnp.int32)
    b = jnp.asarray(extra_tuple, dtype=jnp.int32)
    return _concat_call_jit(a, b)


class M:
    """JAX equivalent of the PyTorch module M.

    operator.add on two Python tuples is host-time concatenation; this is the
    production path (no device work is needed or performed).
    """

    def forward(self, x253):
        return tuple(x253) + (12, 64)


if __name__ == "__main__":
    _ = jax.random.PRNGKey(0)  # module has no tensor inputs or parameters

    x253 = (1, 384)
    expected = x253 + (12, 64)  # == (1, 384, 12, 64)

    # Production (host) path — the module's exact semantics.
    m = M()
    x254 = m.forward(x253)
    assert x254 == expected, f"got {x254}, expected {expected}"

    # Exercise the Pallas kernel once on device and verify with one bulk readback.
    out_dev = jax.block_until_ready(tuple_add_pallas(x253, (12, 64)))
    dev_tuple = tuple(int(v) for v in out_dev.tolist())
    assert dev_tuple == expected, f"kernel got {dev_tuple}, expected {expected}"

    print("KERNEL_OK")
</pallas_src>

<mosaic_0001>
module attributes {stable_mosaic.version = 11 : i64} {
  func.func @_concat_smem_kernel(%arg0: memref<2xi32, #tpu.memory_space<smem>>, %arg1: memref<2xi32, #tpu.memory_space<smem>>, %arg2: memref<4xi32, #tpu.memory_space<smem>>) attributes {dimension_semantics = [], scalar_prefetch = 0 : i64, scratch_operands = 0 : i64, tpu.core_type = #tpu.core_type<tc>} {
    %c0 = arith.constant 0 : index
    %0 = memref.load %arg0[%c0] : memref<2xi32, #tpu.memory_space<smem>>
    %c0_0 = arith.constant 0 : index
    %1 = memref.load %arg2[%c0_0] : memref<4xi32, #tpu.memory_space<smem>>
    memref.store %0, %arg2[%c0_0] : memref<4xi32, #tpu.memory_space<smem>>
    %c1 = arith.constant 1 : index
    %2 = memref.load %arg0[%c1] : memref<2xi32, #tpu.memory_space<smem>>
    %c1_1 = arith.constant 1 : index
    %3 = memref.load %arg2[%c1_1] : memref<4xi32, #tpu.memory_space<smem>>
    memref.store %2, %arg2[%c1_1] : memref<4xi32, #tpu.memory_space<smem>>
    %c0_2 = arith.constant 0 : index
    %4 = memref.load %arg1[%c0_2] : memref<2xi32, #tpu.memory_space<smem>>
    %c2 = arith.constant 2 : index
    %5 = memref.load %arg2[%c2] : memref<4xi32, #tpu.memory_space<smem>>
    memref.store %4, %arg2[%c2] : memref<4xi32, #tpu.memory_space<smem>>
    %c1_3 = arith.constant 1 : index
    %6 = memref.load %arg1[%c1_3] : memref<2xi32, #tpu.memory_space<smem>>
    %c3 = arith.constant 3 : index
    %7 = memref.load %arg2[%c3] : memref<4xi32, #tpu.memory_space<smem>>
    memref.store %6, %arg2[%c3] : memref<4xi32, #tpu.memory_space<smem>>
    return
  }
}

</mosaic_0001>

<bundles_post_ra>
// kernel: tpu_custom_call.1
= control target key start
LH: loop header
LB: loop body
LE: loop exit
PB: predicated region body
PF: predicated region fallthrough
CT: control target
= control target key end

     0   :  { %7 = vsyncpa [#allocation3], 0  ;;  %s140_s0 = inlined_call_operand.hbm [shape: s32[2], index: 0, kind: input, shape index: {}]   ;;  %s141_s1 = inlined_call_operand.hbm [shape: s32[2], index: 1, kind: input, shape index: {}]   ;;  %s142_s2 = inlined_call_operand.hbm [shape: s32[4], index: 2, kind: output, shape index: {}]  }
   0x1   :  { %8 = vsyncpa [#allocation6], 0 }
   0x2   :  { %9 = vsyncpa [#allocation4], 0  ;;  %s15_s11 = sshll.u32 %s140_s0, 4  ;;  %s24_s14 = sshll.u32 %s141_s1, 4  ;;  %s16_s11 = int_to_ptr.hbm [resolvable:$true] %s15_s11  ;;  %s25_s14 = int_to_ptr.hbm [resolvable:$true] %s24_s14 }
   0x3   :  { %s113_s15 = smov [#allocation2]   ;;  %s114_s16 = smov [#allocation5]  }
   0x4   :  { %18 = dma.hbm_to_smem %s16_s11, 16, %s113_s15, [#allocation3]  }
   0x5   :  { %27 = dma.hbm_to_smem %s25_s14, 16, %s114_s16, [#allocation6]  }
   0x6   :  { %107 = dma.done.wait [#allocation3], 16  }
   0x7   :  { %108 = vsyncadd [#allocation3], 4294967280 }
   0x8   :  { %109 = dma.done.wait [#allocation6], 16  }
   0x9   :  { %110 = vsyncadd [#allocation6], 4294967280 }
   0xa   :  { %36 = sfence }
   0xb   :  { %s37_s17 = sld [smem:[#allocation2]]  ;;  %s54_s22 = sshll.u32 %s142_s2, 4  ;;  %s55_s22 = int_to_ptr.hbm [resolvable:$true] %s54_s22 }
   0xc   :  { %s66_s18 = sld [smem:[#allocation2 + $0x1]]  ;;  %s115_s1 = smov [#allocation7]  }
   0xd   :  { %s43_s19 = sld [smem:[#allocation5]] }
   0xe   :  { %s67_s20 = sld [smem:[#allocation5 + $0x1]] }
  0x11   :  { %39 = sst [smem:[#allocation7]] %s37_s17 }
  0x12   :  { %42 = sst [smem:[#allocation7 + $0x1]] %s66_s18 }
  0x13   :  { %45 = sst [smem:[#allocation7 + $0x2]] %s43_s19 }
  0x14   :  { %48 = sst [smem:[#allocation7 + $0x3]] %s67_s20 }
  0x15   :  { %57 = dma.smem_to_hbm %s115_s1, 16, %s55_s22, [#allocation4]  }
  0x16   :  { %111 = dma.done.wait [#allocation4], 16  }
  0x17   :  { %112 = vsyncadd [#allocation4], 4294967280 }
  0x18   :  { %62 = sfence }
  0x19   :  { %63 = vsyncpa [#allocation3], 1 }
  0x1a   :  { %64 = vsyncpa [#allocation6], 1 }
  0x1b   :  { %65 = vsyncpa [#allocation4], 1 }

</bundles_post_ra>
